<compile_context>
chip_gen: v7x
topology: tpu7x:2x2x1
jax: 0.10.0
libtpu: 0.0.40
codegen_flags: <defaults>
</compile_context>

<pallas_src>
import jax
import jax.numpy as jnp
from jax import lax
from jax.experimental import pallas as pl
from jax.experimental.pallas import tpu as pltpu

# ---- model config (from the synthetic "gen" dict the module is built from) ----
N, Cin, H, W = 2, 4, 16, 16
Cout = 8
KH = KW = 3
PAD = 1
POOL = 2
HP, WP = H // POOL, W // POOL
FEAT = Cout * HP * WP            # 512
NCLASS = 10

LANES = W * Cout                 # 128: conv-output lane dim, ordered (w, cout)
PLANES = (W - 1) * Cout          # 120: lanes after the pairwise W-direction max


def fused_forward_kernel(x_ref, bw_ref, cb_ref, lw_ref, lb_ref, o_ref, xpad_ref):
    """Entire network in one kernel invocation; everything stays in VMEM.

    x_ref   : (N, H, W*Cin)         NHWC input with W and Cin merged on lanes
    bw_ref  : (KH, W*Cin, W*Cout)   banded conv weights (W-padding folded in)
    cb_ref  : (1, W*Cout)           conv bias tiled per output column
    lw_ref  : (HP, PLANES, NCLASS)  linear weight permuted to the pooled layout
    lb_ref  : (1, NCLASS)           linear bias
    o_ref   : (N, NCLASS)           logits
    xpad_ref: (N, H+2, W*Cin)       scratch: input zero-padded along H only
    """
    # Zero-pad along H inside the kernel (W padding lives in bw's band structure).
    xpad_ref[...] = jnp.zeros_like(xpad_ref)
    xpad_ref[:, PAD:PAD + H, :] = x_ref[...]

    # Conv2d(3x3, pad=1) as 3 banded matmuls: (N*H, W*Cin) @ (W*Cin, W*Cout).
    acc = jnp.zeros((N * H, LANES), jnp.float32)
    for kh in range(KH):
        lhs = xpad_ref[:, kh:kh + H, :].reshape(N * H, W * Cin)
        acc += jnp.dot(lhs, bw_ref[kh], preferred_element_type=jnp.float32)
    acc = jnp.maximum(acc + cb_ref[...], 0.0)      # bias + ReLU; rows=(n,h), lanes=(w,c)

    # MaxPool2d(2, 2): sublane max over H pairs, lane-shifted max over W pairs.
    t = jnp.max(acc.reshape(N * HP, POOL, LANES), axis=1)      # (N*HP, 128), rows=(n,hp)
    m = jnp.maximum(t[:, :PLANES], t[:, Cout:])                # (N*HP, 120); valid at even w-groups
    m3 = m.reshape(N, HP, PLANES)

    # Flatten + Linear: contract (hp, lane) against the permuted/zero-padded weight.
    logits = jnp.zeros((N, NCLASS), jnp.float32)
    for hp in range(HP):
        logits += jnp.dot(m3[:, hp, :], lw_ref[hp],
                          preferred_element_type=jnp.float32)
    o_ref[...] = (logits + lb_ref[...]).astype(o_ref.dtype)


def prepare_params(conv_w, conv_b, lin_w, lin_b):
    """One-time (out of the hot path) repack of the PyTorch-layout parameters."""
    f32 = jnp.float32
    # Banded conv weights: bw[kh, j*Cin+ci, w*Cout+co] = conv_w[co, ci, kh, j-w+PAD]
    # inside the 3-tap band, zero outside => 'same' W padding is built in.
    w_hwio = jnp.transpose(conv_w, (2, 3, 1, 0)).astype(f32)        # (KH, KW, Cin, Cout)
    j = jnp.arange(W)[None, :, None]                                # input column
    w = jnp.arange(W)[None, None, :]                                # output column
    kw = jnp.arange(KW)[:, None, None]
    band = (j == w + kw - PAD).astype(f32)                          # (KW, W, W)
    bw = jnp.einsum('qjw,hqio->hjiwo', band, w_hwio).reshape(KH, W * Cin, W * Cout)
    cb = jnp.tile(conv_b.astype(f32), W).reshape(1, W * Cout)       # lane (w,c) -> conv_b[c]

    # Linear weight permuted to the kernel's pooled-activation layout:
    #   feature (row hp, lane g*Cout+c) with even g  <->  PyTorch flat index
    #   c*HP*WP + hp*WP + g//2 ; odd-g lanes are pooling leftovers -> zero rows.
    lw4 = lin_w.astype(f32).reshape(NCLASS, Cout, HP, WP)           # [o, c, hp, wp]
    z = jnp.transpose(lw4, (2, 3, 1, 0))                            # [hp, wp, c, o]
    zi = jnp.stack([z, jnp.zeros_like(z)], axis=2)                  # [hp, wp, parity, c, o]
    lw = zi.reshape(HP, W, Cout, NCLASS)[:, :W - 1].reshape(HP, PLANES, NCLASS)
    lb = lin_b.astype(f32).reshape(1, NCLASS)
    return bw, cb, lw, lb


@jax.jit
def nn_model_forward(x_nchw, bw, cb, lw, lb):
    """Hot path: one tiny fused layout op + ONE pallas_call for the whole network."""
    x_prep = jnp.transpose(x_nchw, (0, 2, 3, 1)).reshape(N, H, W * Cin)
    return pl.pallas_call(
        fused_forward_kernel,
        out_shape=jax.ShapeDtypeStruct((N, NCLASS), jnp.float32),
        grid=(1,),
        in_specs=[
            pl.BlockSpec((N, H, W * Cin), lambda i: (0, 0, 0)),
            pl.BlockSpec((KH, W * Cin, W * Cout), lambda i: (0, 0, 0)),
            pl.BlockSpec((1, W * Cout), lambda i: (0, 0)),
            pl.BlockSpec((HP, PLANES, NCLASS), lambda i: (0, 0, 0)),
            pl.BlockSpec((1, NCLASS), lambda i: (0, 0)),
        ],
        out_specs=pl.BlockSpec((N, NCLASS), lambda i: (0, 0)),
        scratch_shapes=[pltpu.VMEM((N, H + 2 * PAD, W * Cin), jnp.float32)],
    )(x_prep, bw, cb, lw, lb)


def reference_forward(x_nchw, conv_w, conv_b, lin_w, lin_b):
    """Pure-JAX reference mirroring the PyTorch nn.Sequential semantics."""
    y = lax.conv_general_dilated(
        x_nchw, conv_w, window_strides=(1, 1),
        padding=((PAD, PAD), (PAD, PAD)),
        dimension_numbers=("NCHW", "OIHW", "NCHW"))
    y = jnp.maximum(y + conv_b.reshape(1, Cout, 1, 1), 0.0)
    y = lax.reduce_window(y, -jnp.inf, lax.max,
                          (1, 1, POOL, POOL), (1, 1, POOL, POOL), "VALID")
    flat = y.reshape(N, FEAT)
    return flat @ lin_w.T + lin_b


if __name__ == "__main__":
    key = jax.random.PRNGKey(0)
    k_x, k_cw, k_cb, k_lw, k_lb = jax.random.split(key, 5)

    x = jax.random.normal(k_x, (N, Cin, H, W), dtype=jnp.float32)
    conv_w = 0.1 * jax.random.normal(k_cw, (Cout, Cin, KH, KW), dtype=jnp.float32)
    conv_b = 0.1 * jax.random.normal(k_cb, (Cout,), dtype=jnp.float32)
    lin_w = 0.05 * jax.random.normal(k_lw, (NCLASS, FEAT), dtype=jnp.float32)
    lin_b = 0.05 * jax.random.normal(k_lb, (NCLASS,), dtype=jnp.float32)

    params = prepare_params(conv_w, conv_b, lin_w, lin_b)   # one-time weight repack
    out = jax.block_until_ready(nn_model_forward(x, *params))

    ref = jax.block_until_ready(reference_forward(x, conv_w, conv_b, lin_w, lin_b))
    assert out.shape == (N, NCLASS), out.shape
    max_err = jnp.max(jnp.abs(out - ref))
    assert jnp.allclose(out, ref, atol=1e-3, rtol=1e-3), f"max abs err {max_err}"

    print("KERNEL_OK")
</pallas_src>

<mosaic_0001>
module attributes {stable_mosaic.version = 11 : i64} {
  func.func @fused_forward_kernel(%arg0: i32, %arg1: memref<2x16x64xf32, #tpu.memory_space<vmem>>, %arg2: memref<3x64x128xf32, #tpu.memory_space<vmem>>, %arg3: memref<1x128xf32, #tpu.memory_space<vmem>>, %arg4: memref<8x120x10xf32, #tpu.memory_space<vmem>>, %arg5: memref<1x10xf32, #tpu.memory_space<vmem>>, %arg6: memref<2x10xf32, #tpu.memory_space<vmem>>, %arg7: memref<2x18x64xf32, #tpu.memory_space<vmem>>) attributes {dimension_semantics = [#tpu.dimension_semantics<arbitrary>], iteration_bounds = array<i64: 1>, scalar_prefetch = 0 : i64, scratch_operands = 1 : i64, tpu.core_type = #tpu.core_type<tc>, window_params = [{pipeline_mode = #tpu.pipeline_mode<synchronous>, transform_indices = @transform_0, window_bounds = array<i64: 2, 16, 64>}, {pipeline_mode = #tpu.pipeline_mode<synchronous>, transform_indices = @transform_1, window_bounds = array<i64: 3, 64, 128>}, {pipeline_mode = #tpu.pipeline_mode<synchronous>, transform_indices = @transform_2, window_bounds = array<i64: 1, 128>}, {pipeline_mode = #tpu.pipeline_mode<synchronous>, transform_indices = @transform_3, window_bounds = array<i64: 8, 120, 10>}, {pipeline_mode = #tpu.pipeline_mode<synchronous>, transform_indices = @transform_4, window_bounds = array<i64: 1, 10>}, {pipeline_mode = #tpu.pipeline_mode<synchronous>, transform_indices = @transform_5, window_bounds = array<i64: 2, 10>}]} {
    %cst = arith.constant 0.000000e+00 : f32
    %0 = vector.broadcast %cst : f32 to vector<2x18x64xf32>
    %c0 = arith.constant 0 : index
    %c0_0 = arith.constant 0 : index
    %c0_1 = arith.constant 0 : index
    %1 = vector.load %arg7[%c0, %c0_0, %c0_1] : memref<2x18x64xf32, #tpu.memory_space<vmem>>, vector<2x18x64xf32>
    tpu.vector_store %arg7[%c0, %c0_0, %c0_1], %0 {strides = array<i32>} : memref<2x18x64xf32, #tpu.memory_space<vmem>>, vector<2x18x64xf32>,
    %c0_2 = arith.constant 0 : index
    %c0_3 = arith.constant 0 : index
    %c0_4 = arith.constant 0 : index
    %2 = vector.load %arg1[%c0_2, %c0_3, %c0_4] : memref<2x16x64xf32, #tpu.memory_space<vmem>>, vector<2x16x64xf32>
    %c0_5 = arith.constant 0 : index
    %c1 = arith.constant 1 : index
    %c0_6 = arith.constant 0 : index
    %3 = vector.load %arg7[%c0_5, %c1, %c0_6] : memref<2x18x64xf32, #tpu.memory_space<vmem>>, vector<2x16x64xf32>
    tpu.vector_store %arg7[%c0_5, %c1, %c0_6], %2 {strides = array<i32>} : memref<2x18x64xf32, #tpu.memory_space<vmem>>, vector<2x16x64xf32>,
    %cst_7 = arith.constant 0.000000e+00 : f32
    %4 = vector.broadcast %cst_7 : f32 to vector<32x128xf32>
    %c0_8 = arith.constant 0 : index
    %c0_9 = arith.constant 0 : index
    %c0_10 = arith.constant 0 : index
    %5 = vector.load %arg7[%c0_8, %c0_9, %c0_10] : memref<2x18x64xf32, #tpu.memory_space<vmem>>, vector<2x16x64xf32>
    %6 = vector.shape_cast %5 : vector<2x16x64xf32> to vector<32x64xf32>
    %c0_11 = arith.constant 0 : index
    %c0_12 = arith.constant 0 : index
    %c0_13 = arith.constant 0 : index
    %7 = vector.load %arg2[%c0_11, %c0_12, %c0_13] : memref<3x64x128xf32, #tpu.memory_space<vmem>>, vector<1x64x128xf32>
    %8 = vector.shape_cast %7 : vector<1x64x128xf32> to vector<64x128xf32>
    %cst_14 = arith.constant dense<0.000000e+00> : vector<32x128xf32>
    %9 = tpu.matmul %6, %8, %cst_14 {dimension_numbers = #tpu.dot_dimension_numbers<[1], [0], [0], [1], [0, 0, 1, 1], [], []>} : vector<32x64xf32>, vector<64x128xf32>, vector<32x128xf32> -> vector<32x128xf32>
    %10 = arith.addf %4, %9 : vector<32x128xf32>
    %c0_15 = arith.constant 0 : index
    %c1_16 = arith.constant 1 : index
    %c0_17 = arith.constant 0 : index
    %11 = vector.load %arg7[%c0_15, %c1_16, %c0_17] : memref<2x18x64xf32, #tpu.memory_space<vmem>>, vector<2x16x64xf32>
    %12 = vector.shape_cast %11 : vector<2x16x64xf32> to vector<32x64xf32>
    %c1_18 = arith.constant 1 : index
    %c0_19 = arith.constant 0 : index
    %c0_20 = arith.constant 0 : index
    %13 = vector.load %arg2[%c1_18, %c0_19, %c0_20] : memref<3x64x128xf32, #tpu.memory_space<vmem>>, vector<1x64x128xf32>
    %14 = vector.shape_cast %13 : vector<1x64x128xf32> to vector<64x128xf32>
    %cst_21 = arith.constant dense<0.000000e+00> : vector<32x128xf32>
    %15 = tpu.matmul %12, %14, %cst_21 {dimension_numbers = #tpu.dot_dimension_numbers<[1], [0], [0], [1], [0, 0, 1, 1], [], []>} : vector<32x64xf32>, vector<64x128xf32>, vector<32x128xf32> -> vector<32x128xf32>
    %16 = arith.addf %10, %15 : vector<32x128xf32>
    %c0_22 = arith.constant 0 : index
    %c2 = arith.constant 2 : index
    %c0_23 = arith.constant 0 : index
    %17 = vector.load %arg7[%c0_22, %c2, %c0_23] : memref<2x18x64xf32, #tpu.memory_space<vmem>>, vector<2x16x64xf32>
    %18 = vector.shape_cast %17 : vector<2x16x64xf32> to vector<32x64xf32>
    %c2_24 = arith.constant 2 : index
    %c0_25 = arith.constant 0 : index
    %c0_26 = arith.constant 0 : index
    %19 = vector.load %arg2[%c2_24, %c0_25, %c0_26] : memref<3x64x128xf32, #tpu.memory_space<vmem>>, vector<1x64x128xf32>
    %20 = vector.shape_cast %19 : vector<1x64x128xf32> to vector<64x128xf32>
    %cst_27 = arith.constant dense<0.000000e+00> : vector<32x128xf32>
    %21 = tpu.matmul %18, %20, %cst_27 {dimension_numbers = #tpu.dot_dimension_numbers<[1], [0], [0], [1], [0, 0, 1, 1], [], []>} : vector<32x64xf32>, vector<64x128xf32>, vector<32x128xf32> -> vector<32x128xf32>
    %22 = arith.addf %16, %21 : vector<32x128xf32>
    %c0_28 = arith.constant 0 : index
    %c0_29 = arith.constant 0 : index
    %23 = vector.load %arg3[%c0_28, %c0_29] : memref<1x128xf32, #tpu.memory_space<vmem>>, vector<1x128xf32>
    %24 = vector.broadcast %23 : vector<1x128xf32> to vector<32x128xf32>
    %25 = arith.addf %22, %24 : vector<32x128xf32>
    %cst_30 = arith.constant 0.000000e+00 : f32
    %26 = vector.broadcast %cst_30 : f32 to vector<32x128xf32>
    %27 = arith.maximumf %25, %26 : vector<32x128xf32>
    %28 = vector.shape_cast %27 : vector<32x128xf32> to vector<16x2x128xf32>
    %cst_31 = arith.constant dense<0xFF800000> : vector<16x128xf32>
    %29 = vector.multi_reduction <maximumf>, %28, %cst_31 [1] : vector<16x2x128xf32> to vector<16x128xf32>
    %30 = vector.extract_strided_slice %29 {offsets = [0, 0], sizes = [16, 120], strides = [1, 1]} : vector<16x128xf32> to vector<16x120xf32>
    %31 = vector.extract_strided_slice %29 {offsets = [0, 8], sizes = [16, 120], strides = [1, 1]} : vector<16x128xf32> to vector<16x120xf32>
    %32 = arith.maximumf %30, %31 : vector<16x120xf32>
    %33 = vector.shape_cast %32 : vector<16x120xf32> to vector<2x8x120xf32>
    %cst_32 = arith.constant 0.000000e+00 : f32
    %34 = vector.broadcast %cst_32 : f32 to vector<2x10xf32>
    %35 = vector.extract_strided_slice %33 {offsets = [0, 0, 0], sizes = [2, 1, 120], strides = [1, 1, 1]} : vector<2x8x120xf32> to vector<2x1x120xf32>
    %36 = vector.shape_cast %35 : vector<2x1x120xf32> to vector<2x120xf32>
    %c0_33 = arith.constant 0 : index
    %c0_34 = arith.constant 0 : index
    %c0_35 = arith.constant 0 : index
    %37 = vector.load %arg4[%c0_33, %c0_34, %c0_35] : memref<8x120x10xf32, #tpu.memory_space<vmem>>, vector<1x120x10xf32>
    %38 = vector.shape_cast %37 : vector<1x120x10xf32> to vector<120x10xf32>
    %cst_36 = arith.constant dense<0.000000e+00> : vector<2x10xf32>
    %39 = tpu.matmul %36, %38, %cst_36 {dimension_numbers = #tpu.dot_dimension_numbers<[1], [0], [0], [1], [0, 0, 1, 1], [], []>} : vector<2x120xf32>, vector<120x10xf32>, vector<2x10xf32> -> vector<2x10xf32>
    %40 = arith.addf %34, %39 : vector<2x10xf32>
    %41 = vector.extract_strided_slice %33 {offsets = [0, 1, 0], sizes = [2, 1, 120], strides = [1, 1, 1]} : vector<2x8x120xf32> to vector<2x1x120xf32>
    %42 = vector.shape_cast %41 : vector<2x1x120xf32> to vector<2x120xf32>
    %c1_37 = arith.constant 1 : index
    %c0_38 = arith.constant 0 : index
    %c0_39 = arith.constant 0 : index
    %43 = vector.load %arg4[%c1_37, %c0_38, %c0_39] : memref<8x120x10xf32, #tpu.memory_space<vmem>>, vector<1x120x10xf32>
    %44 = vector.shape_cast %43 : vector<1x120x10xf32> to vector<120x10xf32>
    %cst_40 = arith.constant dense<0.000000e+00> : vector<2x10xf32>
    %45 = tpu.matmul %42, %44, %cst_40 {dimension_numbers = #tpu.dot_dimension_numbers<[1], [0], [0], [1], [0, 0, 1, 1], [], []>} : vector<2x120xf32>, vector<120x10xf32>, vector<2x10xf32> -> vector<2x10xf32>
    %46 = arith.addf %40, %45 : vector<2x10xf32>
    %47 = vector.extract_strided_slice %33 {offsets = [0, 2, 0], sizes = [2, 1, 120], strides = [1, 1, 1]} : vector<2x8x120xf32> to vector<2x1x120xf32>
    %48 = vector.shape_cast %47 : vector<2x1x120xf32> to vector<2x120xf32>
    %c2_41 = arith.constant 2 : index
    %c0_42 = arith.constant 0 : index
    %c0_43 = arith.constant 0 : index
    %49 = vector.load %arg4[%c2_41, %c0_42, %c0_43] : memref<8x120x10xf32, #tpu.memory_space<vmem>>, vector<1x120x10xf32>
    %50 = vector.shape_cast %49 : vector<1x120x10xf32> to vector<120x10xf32>
    %cst_44 = arith.constant dense<0.000000e+00> : vector<2x10xf32>
    %51 = tpu.matmul %48, %50, %cst_44 {dimension_numbers = #tpu.dot_dimension_numbers<[1], [0], [0], [1], [0, 0, 1, 1], [], []>} : vector<2x120xf32>, vector<120x10xf32>, vector<2x10xf32> -> vector<2x10xf32>
    %52 = arith.addf %46, %51 : vector<2x10xf32>
    %53 = vector.extract_strided_slice %33 {offsets = [0, 3, 0], sizes = [2, 1, 120], strides = [1, 1, 1]} : vector<2x8x120xf32> to vector<2x1x120xf32>
    %54 = vector.shape_cast %53 : vector<2x1x120xf32> to vector<2x120xf32>
    %c3 = arith.constant 3 : index
    %c0_45 = arith.constant 0 : index
    %c0_46 = arith.constant 0 : index
    %55 = vector.load %arg4[%c3, %c0_45, %c0_46] : memref<8x120x10xf32, #tpu.memory_space<vmem>>, vector<1x120x10xf32>
    %56 = vector.shape_cast %55 : vector<1x120x10xf32> to vector<120x10xf32>
    %cst_47 = arith.constant dense<0.000000e+00> : vector<2x10xf32>
    %57 = tpu.matmul %54, %56, %cst_47 {dimension_numbers = #tpu.dot_dimension_numbers<[1], [0], [0], [1], [0, 0, 1, 1], [], []>} : vector<2x120xf32>, vector<120x10xf32>, vector<2x10xf32> -> vector<2x10xf32>
    %58 = arith.addf %52, %57 : vector<2x10xf32>
    %59 = vector.extract_strided_slice %33 {offsets = [0, 4, 0], sizes = [2, 1, 120], strides = [1, 1, 1]} : vector<2x8x120xf32> to vector<2x1x120xf32>
    %60 = vector.shape_cast %59 : vector<2x1x120xf32> to vector<2x120xf32>
    %c4 = arith.constant 4 : index
    %c0_48 = arith.constant 0 : index
    %c0_49 = arith.constant 0 : index
    %61 = vector.load %arg4[%c4, %c0_48, %c0_49] : memref<8x120x10xf32, #tpu.memory_space<vmem>>, vector<1x120x10xf32>
    %62 = vector.shape_cast %61 : vector<1x120x10xf32> to vector<120x10xf32>
    %cst_50 = arith.constant dense<0.000000e+00> : vector<2x10xf32>
    %63 = tpu.matmul %60, %62, %cst_50 {dimension_numbers = #tpu.dot_dimension_numbers<[1], [0], [0], [1], [0, 0, 1, 1], [], []>} : vector<2x120xf32>, vector<120x10xf32>, vector<2x10xf32> -> vector<2x10xf32>
    %64 = arith.addf %58, %63 : vector<2x10xf32>
    %65 = vector.extract_strided_slice %33 {offsets = [0, 5, 0], sizes = [2, 1, 120], strides = [1, 1, 1]} : vector<2x8x120xf32> to vector<2x1x120xf32>
    %66 = vector.shape_cast %65 : vector<2x1x120xf32> to vector<2x120xf32>
    %c5 = arith.constant 5 : index
    %c0_51 = arith.constant 0 : index
    %c0_52 = arith.constant 0 : index
    %67 = vector.load %arg4[%c5, %c0_51, %c0_52] : memref<8x120x10xf32, #tpu.memory_space<vmem>>, vector<1x120x10xf32>
    %68 = vector.shape_cast %67 : vector<1x120x10xf32> to vector<120x10xf32>
    %cst_53 = arith.constant dense<0.000000e+00> : vector<2x10xf32>
    %69 = tpu.matmul %66, %68, %cst_53 {dimension_numbers = #tpu.dot_dimension_numbers<[1], [0], [0], [1], [0, 0, 1, 1], [], []>} : vector<2x120xf32>, vector<120x10xf32>, vector<2x10xf32> -> vector<2x10xf32>
    %70 = arith.addf %64, %69 : vector<2x10xf32>
    %71 = vector.extract_strided_slice %33 {offsets = [0, 6, 0], sizes = [2, 1, 120], strides = [1, 1, 1]} : vector<2x8x120xf32> to vector<2x1x120xf32>
    %72 = vector.shape_cast %71 : vector<2x1x120xf32> to vector<2x120xf32>
    %c6 = arith.constant 6 : index
    %c0_54 = arith.constant 0 : index
    %c0_55 = arith.constant 0 : index
    %73 = vector.load %arg4[%c6, %c0_54, %c0_55] : memref<8x120x10xf32, #tpu.memory_space<vmem>>, vector<1x120x10xf32>
    %74 = vector.shape_cast %73 : vector<1x120x10xf32> to vector<120x10xf32>
    %cst_56 = arith.constant dense<0.000000e+00> : vector<2x10xf32>
    %75 = tpu.matmul %72, %74, %cst_56 {dimension_numbers = #tpu.dot_dimension_numbers<[1], [0], [0], [1], [0, 0, 1, 1], [], []>} : vector<2x120xf32>, vector<120x10xf32>, vector<2x10xf32> -> vector<2x10xf32>
    %76 = arith.addf %70, %75 : vector<2x10xf32>
    %77 = vector.extract_strided_slice %33 {offsets = [0, 7, 0], sizes = [2, 1, 120], strides = [1, 1, 1]} : vector<2x8x120xf32> to vector<2x1x120xf32>
    %78 = vector.shape_cast %77 : vector<2x1x120xf32> to vector<2x120xf32>
    %c7 = arith.constant 7 : index
    %c0_57 = arith.constant 0 : index
    %c0_58 = arith.constant 0 : index
    %79 = vector.load %arg4[%c7, %c0_57, %c0_58] : memref<8x120x10xf32, #tpu.memory_space<vmem>>, vector<1x120x10xf32>
    %80 = vector.shape_cast %79 : vector<1x120x10xf32> to vector<120x10xf32>
    %cst_59 = arith.constant dense<0.000000e+00> : vector<2x10xf32>
    %81 = tpu.matmul %78, %80, %cst_59 {dimension_numbers = #tpu.dot_dimension_numbers<[1], [0], [0], [1], [0, 0, 1, 1], [], []>} : vector<2x120xf32>, vector<120x10xf32>, vector<2x10xf32> -> vector<2x10xf32>
    %82 = arith.addf %76, %81 : vector<2x10xf32>
    %c0_60 = arith.constant 0 : index
    %c0_61 = arith.constant 0 : index
    %83 = vector.load %arg5[%c0_60, %c0_61] : memref<1x10xf32, #tpu.memory_space<vmem>>, vector<1x10xf32>
    %84 = vector.broadcast %83 : vector<1x10xf32> to vector<2x10xf32>
    %85 = arith.addf %82, %84 : vector<2x10xf32>
    %c0_62 = arith.constant 0 : index
    %c0_63 = arith.constant 0 : index
    %86 = vector.load %arg6[%c0_62, %c0_63] : memref<2x10xf32, #tpu.memory_space<vmem>>, vector<2x10xf32>
    tpu.vector_store %arg6[%c0_62, %c0_63], %85 {strides = array<i32>} : memref<2x10xf32, #tpu.memory_space<vmem>>, vector<2x10xf32>,
    return
  }
  func.func @transform_0(%arg0: i32) -> (i32, i32, i32) {
    %c0_i32 = arith.constant 0 : i32
    %c0_i32_0 = arith.constant 0 : i32
    %c0_i32_1 = arith.constant 0 : i32
    %c0_i32_2 = arith.constant 0 : i32
    return %c0_i32, %c0_i32_0, %c0_i32_1 : i32, i32, i32
  }
  func.func @transform_1(%arg0: i32) -> (i32, i32, i32) {
    %c0_i32 = arith.constant 0 : i32
    %c0_i32_0 = arith.constant 0 : i32
    %c0_i32_1 = arith.constant 0 : i32
    %c0_i32_2 = arith.constant 0 : i32
    return %c0_i32, %c0_i32_0, %c0_i32_1 : i32, i32, i32
  }
  func.func @transform_2(%arg0: i32) -> (i32, i32) {
    %c0_i32 = arith.constant 0 : i32
    %c0_i32_0 = arith.constant 0 : i32
    %c0_i32_1 = arith.constant 0 : i32
    return %c0_i32, %c0_i32_0 : i32, i32
  }
  func.func @transform_3(%arg0: i32) -> (i32, i32, i32) {
    %c0_i32 = arith.constant 0 : i32
    %c0_i32_0 = arith.constant 0 : i32
    %c0_i32_1 = arith.constant 0 : i32
    %c0_i32_2 = arith.constant 0 : i32
    return %c0_i32, %c0_i32_0, %c0_i32_1 : i32, i32, i32
  }
  func.func @transform_4(%arg0: i32) -> (i32, i32) {
    %c0_i32 = arith.constant 0 : i32
    %c0_i32_0 = arith.constant 0 : i32
    %c0_i32_1 = arith.constant 0 : i32
    return %c0_i32, %c0_i32_0 : i32, i32
  }
  func.func @transform_5(%arg0: i32) -> (i32, i32) {
    %c0_i32 = arith.constant 0 : i32
    %c0_i32_0 = arith.constant 0 : i32
    %c0_i32_1 = arith.constant 0 : i32
    return %c0_i32, %c0_i32_0 : i32, i32
  }
}

</mosaic_0001>

<bundles_post_ra>
// kernel: nn_model_forward.1
= control target key start
LH: loop header
LB: loop body
LE: loop exit
PB: predicated region body
PF: predicated region fallthrough
CT: control target
= control target key end

     0   :  { %vm21_vm0 = vcmask 523264   ;;  %vm24_vm1 = vcmask 517120   ;;  %v2324_v5 = vmov 0.0   ;;  %s3073_s0 = inlined_call_operand.vmem [shape: f32[2,16,64], index: 0, kind: input, shape index: {}]   ;;  %s3074_s1 = inlined_call_operand.vmem [shape: f32[3,64,128], index: 1, kind: input, shape index: {}]   ;;  %s3075_s2 = inlined_call_operand.vmem [shape: f32[1,128], index: 2, kind: input, shape index: {}]   ;;  %s3076_s3 = inlined_call_operand.vmem [shape: f32[8,120,10], index: 3, kind: input, shape index: {}]   ;;  %s3077_s4 = inlined_call_operand.vmem [shape: f32[1,10], index: 4, kind: input, shape index: {}]   ;;  %s3078_s5 = inlined_call_operand.hbm [shape: f32[2,10], index: 5, kind: output, shape index: {}]  }
   0x1   :  { %v1433_v0 = vld [vmem:[%s3074_s1 + $0x40] sm:$0xff]  ;;  %v1434_v1 = vld [vmem:[%s3074_s1 + $0x48] sm:$0xff]  ;;  %v1435_v2 = vld [vmem:[%s3074_s1 + $0x50] sm:$0xff]  ;;  %22 = vst.msk [vmem:[#allocation2] sm:$0xff] %vm21_vm0, %v2324_v5 }
   0x2   :  { %v2070_v3 = vpack.c.bf16 %v1434_v1, %v1433_v0  ;;  %v1436_v4 = vld [vmem:[%s3074_s1 + $0x58] sm:$0xff]  ;;  %23 = vst.msk [vmem:[#allocation2 + $0x8] sm:$0xff] %vm21_vm0, %v2324_v5  ;;  %26 = vst.msk [vmem:[#allocation2 + $0x18] sm:$0xff] %vm21_vm0, %v2324_v5  ;;  %v1437_v7 = vld [vmem:[%s3074_s1 + $0x60] sm:$0xff] }
   0x3   :  { %27 = vst.msk [vmem:[#allocation2 + $0x20] sm:$0xff] %vm21_vm0, %v2324_v5  ;;  %v2074_v6 = vpack.c.bf16 %v1436_v4, %v1435_v2  ;;  %v1438_v8 = vld [vmem:[%s3074_s1 + $0x68] sm:$0xff]  ;;  %v29_v9 = vld [vmem:[%s3073_s0] sm:$0xff]  ;;  %v31_v12 = vld [vmem:[%s3073_s0 + $0x10] sm:$0xff] }
   0x4   :  { %25 = vst.msk [vmem:[#allocation2 + $0x10] sm:$0x3] %vm24_vm1, %v2324_v5  ;;  %28 = vst.msk [vmem:[#allocation2 + $0x28] sm:$0x3] %vm24_vm1, %v2324_v5  ;;  %2071 = vmatprep.subr.bf16.mxu0 %v2070_v3  ;;  %v30_v10 = vld [vmem:[%s3073_s0 + $0x8] sm:$0xff]  ;;  %v2078_v11 = vpack.c.bf16 %v1438_v8, %v1437_v7  ;;  %v1439_v13 = vld [vmem:[%s3074_s1 + $0x70] sm:$0xff] }
   0x5   :  { %33 = vst.msk [vmem:[#allocation2 + $0x1] sm:$0xff] %vm21_vm0, %v29_v9  ;;  %2073 = vmatpush3.bf16.msra.mxu0 %v2070_v3  ;;  %34 = vst.msk [vmem:[#allocation2 + $0x9] sm:$0xff] %vm21_vm0, %v30_v10  ;;  %v1440_v14 = vld [vmem:[%s3074_s1 + $0x78] sm:$0xff] }
   0x6   :  { %2075 = vmatprep.subr.bf16.mxu0 %v2074_v6  ;;  %35 = vst.msk [vmem:[#allocation2 + $0x19] sm:$0xff] %vm21_vm0, %v31_v12  ;;  %v32_v15 = vld [vmem:[%s3073_s0 + $0x18] sm:$0xff]  ;;  %v2082_v16 = vpack.c.bf16 %v1440_v14, %v1439_v13 }
   0x7   :  { %36 = vst.msk [vmem:[#allocation2 + $0x21] sm:$0xff] %vm21_vm0, %v32_v15 }
   0x9   :  { %2077 = vmatpush3.bf16.msra.mxu0 %v2074_v6 }
   0xa   :  { %2079 = vmatprep.subr.bf16.mxu0 %v2078_v11 }
   0xb   :  { %10 = vsyncpa [#allocation4], 0  ;;  %v41_v18 = vld [vmem:[%s3074_s1] sm:$0xff]  ;;  %v42_v19 = vld [vmem:[%s3074_s1 + $0x8] sm:$0xff]  ;;  %v2325_v56 = vmov 0.0|0.0   ;;  %vm473_vm2 = vcmask 1041408  }
   0xc   :  { %v49_v17 = vld [vmem:[#allocation2 + $0x1] sm:$0xff]  ;;  %v2086_v20 = vpack.c.bf16 %v42_v19, %v41_v18  ;;  %v43_v21 = vld [vmem:[%s3074_s1 + $0x10] sm:$0xff]  ;;  %v44_v22 = vld [vmem:[%s3074_s1 + $0x18] sm:$0xff]  ;;  %2118 = vmatprep.subr.bf16.mxu1 %v2325_v56  ;;  %vm2328_vm3 = vmmov 0   ;;  %vm702_vm4 = vcmask 982016   ;;  %vm700_vm5 = vcmask 1041409  }
   0xd   :  { %1756 = vmatprep.mubr.msk.f32.mxu0 %vm21_vm0, %v49_v17  ;;  %2081 = vmatpush3.bf16.msra.mxu0 %v2078_v11  ;;  %v50_v23 = vld [vmem:[#allocation2 + $0x9] sm:$0xff]  ;;  %v2090_v24 = vpack.c.bf16 %v44_v22, %v43_v21  ;;  %v51_v25 = vld [vmem:[#allocation2 + $0x19] sm:$0xff]  ;;  %v2326_v21 = vmov 1983009808   ;;  %s2329_s16 = smov [#allocation3]   ;;  %vm1417_vm6 = vcmask 74752  }
   0xe   :  { %2083 = vmatprep.subr.bf16.mxu0 %v2082_v16  ;;  %v45_v26 = vld [vmem:[%s3074_s1 + $0x20] sm:$0xff]  ;;  %v46_v27 = vld [vmem:[%s3074_s1 + $0x28] sm:$0xff]  ;;  %v47_v31 = vld [vmem:[%s3074_s1 + $0x30] sm:$0xff]  ;;  %v391_v22 = vunpack.c.l.s4 %v2326_v21  ;;  %1836 = vmatprep.mubr.msk.f32.mxu1 %vm2328_vm3, %v2324_v5  ;;  %s1425_s17 = sshll.u32 %s2329_s16, 4  ;;  %s1426_s17 = int_to_ptr.vmem [resolvable:$true] %s1425_s17 }
   0xf   :  { %v52_v28 = vld [vmem:[#allocation2 + $0x21] sm:$0xff]  ;;  %v2094_v29 = vpack.c.bf16 %v46_v27, %v45_v26  ;;  %v48_v32 = vld [vmem:[%s3074_s1 + $0x38] sm:$0xff]  ;;  %v1451_v37 = vld [vmem:[%s3074_s1 + $0x90] sm:$0xff]  ;;  %s2300_s18 = scalar_lea.vmem %s1426_s17, 32  ;;  %p2305_p1 = scmp.lt.s32.totalorder %s1426_s17, %s1426_s17 }
  0x10   :  { %v37_v30 = vld [vmem:[#allocation2] sm:$0xff]  ;;  %v2098_v33 = vpack.c.bf16 %v48_v32, %v47_v31  ;;  %v1450_v35 = vld [vmem:[%s3074_s1 + $0x88] sm:$0xff]  ;;  %v1452_v38 = vld [vmem:[%s3074_s1 + $0x98] sm:$0xff]  ;;  %p2301_p0 = scmp.ne.s32.totalorder %s1426_s17, %s2300_s18  ;;  %p2306_p2 = scmp.lt.s32.totalorder %s2300_s18, %s2300_s18 }
  0x11   :  { %2085 = vmatpush3.bf16.msra.mxu0 %v2082_v16  ;;  %v1449_v34 = vld [vmem:[%s3074_s1 + $0x80] sm:$0xff]  ;;  %v38_v39 = vld [vmem:[#allocation2 + $0x8] sm:$0xff]  ;;  %v2106_v40 = vpack.c.bf16 %v1452_v38, %v1451_v37  ;;  %v39_v41 = vld [vmem:[#allocation2 + $0x18] sm:$0xff] }
  0x12   :  { %2087 = vmatprep.subr.bf16.mxu0 %v2086_v20  ;;  %v2102_v36 = vpack.c.bf16 %v1450_v35, %v1449_v34  ;;  %v1453_v42 = vld [vmem:[%s3074_s1 + $0xa0] sm:$0xff]  ;;  %v1454_v43 = vld [vmem:[%s3074_s1 + $0xa8] sm:$0xff]  ;;  %v1455_v47 = vld [vmem:[%s3074_s1 + $0xb0] sm:$0xff]  ;;  %p2307_p3 = por %p2306_p2, %p2305_p1 }
  0x13   :  { %v40_v44 = vld [vmem:[#allocation2 + $0x20] sm:$0xff]  ;;  %v2110_v45 = vpack.c.bf16 %v1454_v43, %v1453_v42  ;;  %v1456_v48 = vld [vmem:[%s3074_s1 + $0xb8] sm:$0xff]  ;;  %v257_v50 = vld [vmem:[#allocation2 + $0xa] sm:$0xff] }
  0x14   :  { %1757 = vmatmul.mubr.msk.f32.vlgmr.msra.gmra.mrb[0].mxu0 %vm21_vm0, %v50_v23  ;;  %v256_v46 = vld [vmem:[#allocation2 + $0x2] sm:$0xff]  ;;  %v2114_v49 = vpack.c.bf16 %v1456_v48, %v1455_v47  ;;  %v258_v51 = vld [vmem:[#allocation2 + $0x1a] sm:$0xff]  ;;  %v1465_v58 = vld [vmem:[%s3076_s3 + $0x90] sm:$0xff]  ;;  %v393_v23 = vlaneseq  ;;  %p2308_p4 = pnand %p2307_p3, %p2301_p0 }
  0x15   :  { %2089 = vmatpush3.bf16.msra.mxu0 %v2086_v20  ;;  %1759 = vmatprep.mubr.msk.f32.mxu0 %vm21_vm0, %v51_v25  ;;  %v259_v52 = vld [vmem:[#allocation2 + $0x22] sm:$0xff]  ;;  %v1462_v53 = vld [vmem:[%s3076_s3 + $0x78] sm:$0xff]  ;;  %v1479_v59 = vld [vmem:[%s3076_s3 + $0xf0] sm:$0xff]  ;;  %v392_v25 = vunpack.c.0.s8 %v391_v22 }
  0x16   :  { %2091 = vmatprep.subr.bf16.mxu0 %v2090_v24  ;;  %v1463_v54 = vld [vmem:[%s3076_s3 + $0x80] sm:$0xff]  ;;  %v1464_v55 = vld [vmem:[%s3076_s3 + $0x88] sm:$0xff]  ;;  %v1480_v60 = vld [vmem:[%s3076_s3 + $0xf8] sm:$0xff]  ;;  %v394_v26 = vshrl.u32 %v393_v23, 7 }
  0x17   :  { %v2119_v57 = vpack.c.bf16 %v1463_v54, %v1462_v53  ;;  %v2161_v61 = vpack.c.bf16 %v1480_v60, %v1479_v59  ;;  %v1481_v62 = vld [vmem:[%s3076_s3 + $0x100] sm:$0xff]  ;;  %v2122_v63 = vpack.c.bf16 %v1465_v58, %v1464_v55  ;;  %v1482_v0 = vld [vmem:[%s3076_s3 + $0x108] sm:$0xff]  ;;  %v1466_v1 = vld [vmem:[%s3076_s3 + $0x98] sm:$0xff] }
  0x18   :  { %1760 = vmatmul.mubr.msk.f32.gmra.mrb[2].mxu0 %vm21_vm0, %v52_v28  ;;  %v1467_v2 = vld [vmem:[%s3076_s3 + $0xa0] sm:$0xff]  ;;  %v2164_v3 = vpack.c.bf16 %v1482_v0, %v1481_v62  ;;  %v1483_v4 = vld [vmem:[%s3076_s3 + $0x110] sm:$0xff]  ;;  %v1484_v6 = vld [vmem:[%s3076_s3 + $0x118] sm:$0xff] }
  0x19   :  { %2093 = vmatpush3.bf16.msra.mxu0 %v2090_v24  ;;  %1778 = vmatprep.mubr.msk.f32.mxu0 %vm21_vm0, %v37_v30  ;;  %v2125_v7 = vpack.c.bf16 %v1467_v2, %v1466_v1  ;;  %v1468_v8 = vld [vmem:[%s3076_s3 + $0xa8] sm:$0xff]  ;;  %v1469_v9 = vld [vmem:[%s3076_s3 + $0xb0] sm:$0xff]  ;;  %v2167_v10 = vpack.c.bf16 %v1484_v6, %v1483_v4  ;;  %v1485_v11 = vld [vmem:[%s3076_s3 + $0x120] sm:$0xff]  ;;  %v2545_v30 = vsub.s32 %v392_v25, %v394_v26 }
  0x1a   :  { %2095 = vmatprep.subr.bf16.mxu0 %v2094_v29  ;;  %2120 = vmatpush3.bf16.msra.mxu1 %v2119_v57  ;;  %v1486_v12 = vld [vmem:[%s3076_s3 + $0x128] sm:$0xff]  ;;  %v2128_v13 = vpack.c.bf16 %v1469_v9, %v1468_v8  ;;  %v1470_v14 = vld [vmem:[%s3076_s3 + $0xb8] sm:$0xff]  ;;  %v1471_v15 = vld [vmem:[%s3076_s3 + $0xc0] sm:$0xff] }
  0x1b   :  { %2121 = vmatprep.subr.bf16.mxu1 %v2325_v56  ;;  %v2170_v16 = vpack.c.bf16 %v1486_v12, %v1485_v11  ;;  %v2131_v17 = vpack.c.bf16 %v1471_v15, %v1470_v14  ;;  %v1472_v18 = vld [vmem:[%s3076_s3 + $0xc8] sm:$0xff]  ;;  %v1473_v19 = vld [vmem:[%s3076_s3 + $0xd0] sm:$0xff]  ;;  %v1461_v24 = vld [vmem:[%s3075_s2] ss:$0 sm:$0xff]  ;;  %s2327_s2 = smov 120  }
  0x1c   :  { %v2134_v20 = vpack.c.bf16 %v1473_v19, %v1472_v18 }
  0x1d   :  { %2097 = vmatpush3.bf16.msra.mxu0 %v2094_v29 }
  0x1e   :  { %2099 = vmatprep.subr.bf16.mxu0 %v2098_v33  ;;  %2123 = vmatpush3.bf16.msra.mxu1 %v2122_v63 }
  0x1f   :  { %2124 = vmatprep.subr.bf16.mxu1 %v2325_v56 }
  0x21   :  { %2101 = vmatpush3.bf16.msra.mxu0 %v2098_v33 }
  0x22   :  { %2103 = vmatprep.subr.bf16.mxu0 %v2102_v36  ;;  %2126 = vmatpush3.bf16.msra.mxu1 %v2125_v7 }
  0x23   :  { %2127 = vmatprep.subr.bf16.mxu1 %v2325_v56 }
  0x24   :  { %1779 = vmatmul.mubr.msk.f32.vlgmr.msra.gmra.mrb[0].mxu0 %vm21_vm0, %v38_v39 }
  0x25   :  { %2105 = vmatpush3.bf16.msra.mxu0 %v2102_v36  ;;  %1781 = vmatprep.mubr.msk.f32.mxu0 %vm21_vm0, %v39_v41 }
  0x26   :  { %2107 = vmatprep.subr.bf16.mxu0 %v2106_v40  ;;  %2129 = vmatpush3.bf16.msra.mxu1 %v2128_v13 }
  0x27   :  { %2130 = vmatprep.subr.bf16.mxu1 %v2325_v56 }
  0x28   :  { %1782 = vmatmul.mubr.msk.f32.gmra.mrb[2].mxu0 %vm21_vm0, %v40_v44 }
  0x29   :  { %2109 = vmatpush3.bf16.msra.mxu0 %v2106_v40  ;;  %1800 = vmatprep.mubr.msk.f32.mxu0 %vm21_vm0, %v256_v46 }
  0x2a   :  { %2111 = vmatprep.subr.bf16.mxu0 %v2110_v45  ;;  %2132 = vmatpush3.bf16.msra.mxu1 %v2131_v17 }
  0x2b   :  { %2133 = vmatprep.subr.bf16.mxu1 %v2325_v56 }
  0x2d   :  { %2113 = vmatpush3.bf16.msra.mxu0 %v2110_v45 }
  0x2e   :  { %2115 = vmatprep.subr.bf16.mxu0 %v2114_v49  ;;  %2135 = vmatpush3.bf16.msra.mxu1 %v2134_v20 }
  0x2f   :  { %2136 = vmatprep.subr.bf16.mxu1 %v2325_v56 }
  0x31   :  { %2117 = vmatpush3.bf16.msra.mxu0 %v2114_v49 }
  0x32   :  { %2160 = vmatprep.subr.bf16.mxu0 %v2325_v56 }
  0x34   :  { %1801 = vmatmul.mubr.msk.f32.vlgmr.msra.gmra.mrb[0].mxu0 %vm21_vm0, %v257_v50 }
  0x35   :  { %1803 = vmatprep.mubr.msk.f32.mxu0 %vm21_vm0, %v258_v51  ;;  %2162 = vmatpush3.bf16.msra.mxu0 %v2161_v61 }
  0x36   :  { %2163 = vmatprep.subr.bf16.mxu0 %v2325_v56 }
  0x38   :  { %1804 = vmatmul.mubr.msk.f32.gmra.mrb[2].mxu0 %vm21_vm0, %v259_v52 }
  0x39   :  { %2165 = vmatpush3.bf16.msra.mxu0 %v2164_v3  ;;  %1902 = vmatprep.mubr.msk.f32.mxu0 %vm2328_vm3, %v2324_v5 }
  0x3a   :  { %2166 = vmatprep.subr.bf16.mxu0 %v2325_v56 }
  0x3d   :  { %2168 = vmatpush3.bf16.msra.mxu0 %v2167_v10 }
  0x3e   :  { %2169 = vmatprep.subr.bf16.mxu0 %v2325_v56 }
  0x41   :  { %2171 = vmatpush3.bf16.msra.mxu0 %v2170_v16 }
  0x42   :  { %2172 = vmatprep.subr.bf16.mxu0 %v2325_v56 }
 0x107   :  { %v1802_v27 = vpop.f32.mrb[0].mxu0 }
 0x108   :  { %v378_v28 = vadd.f32 %v1802_v27, %v1461_v24  ;;  %v347_v29 = vpop.f32.mrb[1].mxu0 }
 0x109   :  { %v377_v31 = vadd.f32 %v1461_v24, %v347_v29 }
 0x10a   :  { %v382_v34 = vmax.f32 %v378_v28, 0.0 }
 0x10b   :  { %v381_v32 = vmax.f32 %v377_v31, 0.0  ;;  %v1805_v33 = vpop.f32.mrb[2].mxu0 }
 0x10c   :  { %v357_v35 = vpop.f32.mrb[3].mxu0  ;;  %v380_v38 = vadd.f32 %v1805_v33, %v1461_v24  ;;  %v413_v42 = vrot.slane %v382_v34, %v2545_v30  ;;  %v406_v45 = vcombine.high %v382_v34, %v382_v34 }
 0x10d   :  { %v389_v36 = vcombine.high %v381_v32, %v381_v32  ;;  %v396_v37 = vrot.slane %v381_v32, %v2545_v30  ;;  %v379_v41 = vadd.f32 %v1461_v24, %v357_v35 }
 0x10e   :  { %v384_v46 = vmax.f32 %v380_v38, 0.0  ;;  %v502_v49 = vsel %vm473_vm2, %v413_v42, -inf  ;;  %v2556_v55 = vrot.slane %v406_v45, %v2545_v30  ;;  %v421_v57 = vcombine.high %v413_v42, %v413_v42 }
 0x10f   :  { %v404_v39 = vcombine.high %v396_v37, %v396_v37  ;;  %v474_v40 = vsel %vm473_vm2, %v396_v37, -inf  ;;  %v403_v43 = vrot.slane %v389_v36, %v2545_v30  ;;  %v383_v48 = vmax.f32 %v379_v41, 0.0 }
 0x110   :  { %v475_v44 = vrot.slane %v474_v40, 4  ;;  %v447_v59 = vrot.slane %v384_v46, %v2545_v30  ;;  %v503_v60 = vrot.slane %v502_v49, 4  ;;  %v440_v0 = vcombine.high %v384_v46, %v384_v46 }
 0x111   :  { %v481_v47 = vsel %vm473_vm2, %v404_v39, -inf  ;;  %v405_v50 = vcombine.high %v403_v43, %v403_v43  ;;  %v488_v52 = vsel %vm473_vm2, %v403_v43, -inf  ;;  %v423_v53 = vcombine.high %v383_v48, %v383_v48 }
 0x112   :  { %v476_v51 = vmax.f32 %v474_v40, %v475_v44  ;;  %v430_v54 = vrot.slane %v383_v48, %v2545_v30  ;;  %v482_v58 = vrot.slane %v481_v47, 4  ;;  %v489_v61 = vrot.slane %v488_v52, 4 }
 0x113   :  { %v437_v62 = vrot.slane %v423_v53, %v2545_v30  ;;  %v495_v3 = vsel %vm473_vm2, %v405_v50, -inf  ;;  %v558_v9 = vsel %vm473_vm2, %v447_v59, -inf  ;;  %v422_v21 = vcombine.high %v2556_v55, %v2556_v55 }
 0x114   :  { %v438_v63 = vcombine.high %v430_v54, %v430_v54  ;;  %v530_v1 = vsel %vm473_vm2, %v430_v54, -inf  ;;  %v477_v2 = vrot.slane %v476_v51, 2  ;;  %v483_v12 = vmax.f32 %v481_v47, %v482_v58  ;;  %v1488_v58 = vld [vmem:[%s3076_s3 + $0x138] sm:$0xff] }
 0x115   :  { %v439_v4 = vcombine.high %v437_v62, %v437_v62  ;;  %v531_v6 = vrot.slane %v530_v1, 4  ;;  %v544_v7 = vsel %vm473_vm2, %v437_v62, -inf  ;;  %v490_v14 = vmax.f32 %v488_v52, %v489_v61 }
 0x116   :  { %v537_v8 = vsel %vm473_vm2, %v438_v63, -inf  ;;  %v545_v10 = vrot.slane %v544_v7, 4  ;;  %v496_v15 = vrot.slane %v495_v3, 4  ;;  %v484_v18 = vrot.slane %v483_v12, 2 }
 0x117   :  { %v538_v11 = vrot.slane %v537_v8, 4  ;;  %v532_v13 = vmax.f32 %v530_v1, %v531_v6  ;;  %v551_v16 = vsel %vm473_vm2, %v439_v4, -inf  ;;  %v455_v22 = vcombine.high %v447_v59, %v447_v59  ;;  %v1475_v4 = vld [vmem:[%s3076_s3 + $0xe0] sm:$0xff] }
 0x118   :  { %v546_v19 = vmax.f32 %v544_v7, %v545_v10  ;;  %v552_v20 = vrot.slane %v551_v16, 4  ;;  %v491_v24 = vrot.slane %v490_v14, 2  ;;  %v497_v27 = vmax.f32 %v495_v3, %v496_v15  ;;  %v1474_v3 = vld [vmem:[%s3076_s3 + $0xd8] sm:$0xff] }
 0x119   :  { %v539_v17 = vmax.f32 %v537_v8, %v538_v11  ;;  %v533_v23 = vrot.slane %v532_v13, 2  ;;  %v509_v29 = vsel %vm473_vm2, %v421_v57, -inf  ;;  %v559_v31 = vrot.slane %v558_v9, 4  ;;  %v1487_v57 = vld [vmem:[%s3076_s3 + $0x130] sm:$0xff] }
 0x11a   :  { %v547_v26 = vrot.slane %v546_v19, 2  ;;  %v553_v28 = vmax.f32 %v551_v16, %v552_v20  ;;  %v478_v33 = vmax.f32 %v476_v51, %v477_v2  ;;  %v516_v34 = vsel %vm473_vm2, %v2556_v55, -inf }
 0x11b   :  { %v540_v25 = vrot.slane %v539_v17, 2  ;;  %v534_v32 = vmax.f32 %v532_v13, %v533_v23  ;;  %v454_v35 = vrot.slane %v440_v0, %v2545_v30  ;;  %v485_v37 = vmax.f32 %v483_v12, %v484_v18  ;;  %v1489_v13 = vld [vmem:[%s3076_s3 + $0x140] sm:$0xff] }
 0x11c   :  { %v504_v38 = vmax.f32 %v502_v49, %v503_v60  ;;  %v565_v39 = vsel %vm473_vm2, %v455_v22, -inf  ;;  %v492_v41 = vmax.f32 %v490_v14, %v491_v24  ;;  %v548_v43 = vmax.f32 %v546_v19, %v547_v26  ;;  %v1490_v14 = vld [vmem:[%s3076_s3 + $0x148] sm:$0xff] }
 0x11d   :  { %v541_v36 = vmax.f32 %v539_v17, %v540_v25  ;;  %v535_v40 = vrot.slane %v534_v32, 1  ;;  %v498_v44 = vrot.slane %v497_v27, 2  ;;  %v554_v45 = vrot.slane %v553_v28, 2 }
 0x11e   :  { %v510_v46 = vrot.slane %v509_v29, 4  ;;  %v560_v47 = vmax.f32 %v558_v9, %v559_v31  ;;  %v479_v50 = vrot.slane %v478_v33, 1  ;;  %v566_v51 = vrot.slane %v565_v39, 4 }
 0x11f   :  { %v542_v42 = vrot.slane %v541_v36, 1  ;;  %v2573_v48 = vmax.f32 %v534_v32, %v535_v40  ;;  %v572_v52 = vsel %vm473_vm2, %v454_v35, -inf  ;;  %v486_v53 = vrot.slane %v485_v37, 1 }
 0x120   :  { %v456_v49 = vcombine.high %v454_v35, %v454_v35  ;;  %v493_v54 = vrot.slane %v492_v41, 1  ;;  %v505_v55 = vrot.slane %v504_v38, 2  ;;  %v517_v59 = vrot.slane %v516_v34, 4 }
 0x121   :  { %v2576_v30 = vmax.f32 %v541_v36, %v542_v42  ;;  %618 = vrot.lane.b32.xlu1 %v2573_v48, %s2327_s2  ;;  %v549_v60 = vrot.slane %v548_v43, 1  ;;  %v499_v61 = vmax.f32 %v497_v27, %v498_v44  ;;  %v555_v62 = vmax.f32 %v553_v28, %v554_v45  ;;  %v1491_v27 = vld [vmem:[%s3076_s3 + $0x150] sm:$0xff]  ;;  %v1492_v28 = vld [vmem:[%s3076_s3 + $0x158] sm:$0xff] }
 0x122   :  { %v573_v63 = vrot.slane %v572_v52, 4  ;;  %v2588_v0 = vmax.f32 %v478_v33, %v479_v50  ;;  %v561_v1 = vrot.slane %v560_v47, 2  ;;  %v511_v2 = vmax.f32 %v509_v29, %v510_v46  ;;  %v1476_v29 = vld [vmem:[%s3076_s3 + $0xe8] sm:$0xff]  ;;  %v1493_v46 = vld [vmem:[%s3076_s3 + $0x160] sm:$0xff] }
 0x123   :  { %620 = vrot.lane.b32.xlu0 %v2576_v30, %s2327_s2  ;;  %v2596_v6 = vmax.f32 %v485_v37, %v486_v53  ;;  %v567_v7 = vmax.f32 %v565_v39, %v566_v51  ;;  %v523_v8 = vsel %vm473_vm2, %v422_v21, -inf  ;;  %v2173_v9 = vpack.c.bf16 %v1488_v58, %v1487_v57 }
 0x124   :  { %v2601_v10 = vmax.f32 %v492_v41, %v493_v54  ;;  %v506_v11 = vmax.f32 %v504_v38, %v505_v55  ;;  %v579_v12 = vsel %vm473_vm2, %v456_v49, -inf  ;;  %v2612_v15 = vmax.f32 %v548_v43, %v549_v60 }
 0x125   :  { %602 = vrot.lane.b32.xlu1 %v2588_v0, %s2327_s2  ;;  %v500_v16 = vrot.slane %v499_v61, 1  ;;  %v556_v17 = vrot.slane %v555_v62, 1  ;;  %2174 = vmatpush3.bf16.msra.mxu0 %v2173_v9  ;;  %v2137_v18 = vpack.c.bf16 %v1475_v4, %v1474_v3  ;;  %v562_v19 = vmax.f32 %v560_v47, %v561_v1 }
 0x126   :  { %v512_v20 = vrot.slane %v511_v2, 2  ;;  %v518_v21 = vmax.f32 %v516_v34, %v517_v59  ;;  %v524_v22 = vrot.slane %v523_v8, 4  ;;  %2175 = vmatprep.subr.bf16.mxu0 %v2325_v56  ;;  %v568_v23 = vrot.slane %v567_v7, 2 }
 0x127   :  { %604 = vrot.lane.b32.xlu0 %v2596_v6, %s2327_s2  ;;  %v574_v24 = vmax.f32 %v572_v52, %v573_v63  ;;  %v580_v25 = vrot.slane %v579_v12, 4  ;;  %2138 = vmatpush3.bf16.msra.mxu1 %v2137_v18  ;;  %v2176_v26 = vpack.c.bf16 %v1490_v14, %v1489_v13  ;;  %v2629_v31 = vmax.f32 %v499_v61, %v500_v16  ;;  %v669_v16 = vld [vmem:[%s3076_s3 + $0x18] sm:$0xff] }
 0x128   :  { %1834 = vmatprep.subr.mxu1 %v2324_v5  ;;  %v2631_v32 = vmax.f32 %v555_v62, %v556_v17  ;;  %v507_v33 = vrot.slane %v506_v11, 1  ;;  %v513_v34 = vmax.f32 %v511_v2, %v512_v20  ;;  %v519_v35 = vrot.slane %v518_v21, 2  ;;  %v1512_v20 = vld [vmem:[%s3076_s3 + $0x1e8] sm:$0xff] }
 0x129   :  { %606 = vrot.lane.b32.xlu1 %v2601_v10, %s2327_s2  ;;  %2177 = vmatpush3.bf16.msra.mxu0 %v2176_v26  ;;  %v525_v36 = vmax.f32 %v523_v8, %v524_v22  ;;  %v2179_v37 = vpack.c.bf16 %v1492_v28, %v1491_v27  ;;  %v563_v38 = vrot.slane %v562_v19, 1  ;;  %v569_v39 = vmax.f32 %v567_v7, %v568_v23  ;;  %v666_v7 = vld [vmem:[%s3076_s3] sm:$0xff]  ;;  %v667_v8 = vld [vmem:[%s3076_s3 + $0x8] sm:$0xff]  ;;  %v1514_v28 = vld [vmem:[%s3076_s3 + $0x1f8] sm:$0xff] }
 0x12a   :  { %2178 = vmatprep.subr.bf16.mxu0 %v2325_v56  ;;  %v575_v40 = vrot.slane %v574_v24, 2  ;;  %v581_v41 = vmax.f32 %v579_v12, %v580_v25  ;;  %v2643_v42 = vmax.f32 %v506_v11, %v507_v33  ;;  %v514_v43 = vrot.slane %v513_v34, 1  ;;  %v670_v23 = vld [vmem:[%s3076_s3 + $0x20] sm:$0xff] }
 0x12b   :  { %622 = vrot.lane.b32.xlu0 %v2612_v15, %s2327_s2  ;;  %1835 = vmatpush3.msra.mxu1 %v1476_v29  ;;  %v520_v44 = vmax.f32 %v518_v21, %v519_v35  ;;  %v526_v45 = vrot.slane %v525_v36, 2  ;;  %v2649_v47 = vmax.f32 %v562_v19, %v563_v38  ;;  %v570_v50 = vrot.slane %v569_v39, 1 }
 0x12c   :  { %2139 = vmatprep.subr.bf16.mxu1 %v2325_v56  ;;  %v576_v51 = vmax.f32 %v574_v24, %v575_v40  ;;  %v582_v52 = vrot.slane %v581_v41, 2  ;;  %v2655_v53 = vmax.f32 %v513_v34, %v514_v43  ;;  %v2140_v14 = vpack.c.bf16 %v667_v8, %v666_v7  ;;  %v671_v24 = vld [vmem:[%s3076_s3 + $0x28] sm:$0xff]  ;;  %v673_v34 = vld [vmem:[%s3076_s3 + $0x38] sm:$0xff]  ;;  %v1517_v43 = vld [vmem:[%s3076_s3 + $0x210] sm:$0xff] }
 0x12d   :  { %608 = vrot.lane.b32.xlu1 %v2629_v31, %s2327_s2  ;;  %2180 = vmatpush3.bf16.msra.mxu0 %v2179_v37  ;;  %v521_v49 = vrot.slane %v520_v44, 1  ;;  %v527_v54 = vmax.f32 %v525_v36, %v526_v45  ;;  %v2658_v55 = vmax.f32 %v569_v39, %v570_v50  ;;  %v2146_v33 = vpack.c.bf16 %v671_v24, %v670_v23  ;;  %v1515_v36 = vld [vmem:[%s3076_s3 + $0x200] sm:$0xff]  ;;  %v1516_v37 = vld [vmem:[%s3076_s3 + $0x208] sm:$0xff]  ;;  %v677_v50 = vld [vmem:[%s3076_s3 + $0x58] sm:$0xff] }
 0x12e   :  { %1900 = vmatprep.subr.mxu0 %v2324_v5  ;;  %v577_v57 = vrot.slane %v576_v51, 1  ;;  %v583_v58 = vmax.f32 %v581_v41, %v582_v52  ;;  %v674_v39 = vld [vmem:[%s3076_s3 + $0x40] sm:$0xff]  ;;  %v675_v40 = vld [vmem:[%s3076_s3 + $0x48] sm:$0xff]  ;;  %v2209_v41 = vpack.c.bf16 %v1516_v37, %v1515_v36  ;;  %v1544_v23 = vld [vmem:[%s3076_s3 + $0x2d8] sm:$0xff] }
 0x12f   :  { %624 = vrot.lane.b32.xlu0 %v2631_v32, %s2327_s2  ;;  %v2664_v59 = vmax.f32 %v520_v44, %v521_v49  ;;  %v528_v60 = vrot.slane %v527_v54, 1  ;;  %v1518_v44 = vld [vmem:[%s3076_s3 + $0x218] sm:$0xff]  ;;  %v2152_v45 = vpack.c.bf16 %v675_v40, %v674_v39  ;;  %v1519_v52 = vld [vmem:[%s3076_s3 + $0x220] sm:$0xff]  ;;  %v1520_v49 = vld [vmem:[%s3076_s3 + $0x228] sm:$0xff] }
 0x130   :  { %v2666_v61 = vmax.f32 %v576_v51, %v577_v57  ;;  %v584_v62 = vrot.slane %v583_v58, 1  ;;  %v2212_v51 = vpack.c.bf16 %v1518_v44, %v1517_v43  ;;  %v1502_v36 = vld [vmem:[%s3076_s3 + $0x1a0] sm:$0xff]  ;;  %v1548_v39 = vld [vmem:[%s3076_s3 + $0x2f8] sm:$0xff]  ;;  %v1504_v43 = vld [vmem:[%s3076_s3 + $0x1b0] sm:$0xff] }
 0x131   :  { %610 = vrot.lane.b32.xlu1 %v2643_v42, %s2327_s2  ;;  %1901 = vmatpush3.msra.mxu0 %v1493_v46  ;;  %v2672_v63 = vmax.f32 %v527_v54, %v528_v60  ;;  %v676_v46 = vld [vmem:[%s3076_s3 + $0x50] sm:$0xff]  ;;  %v679_v60 = vld [vmem:[%s3076_s3 + $0x68] sm:$0xff] }
 0x132   :  { %2202 = vmatprep.subr.bf16.mxu0 %v2325_v56  ;;  %v2674_v1 = vmax.f32 %v583_v58, %v584_v62  ;;  %v2155_v54 = vpack.c.bf16 %v677_v50, %v676_v46  ;;  %v678_v58 = vld [vmem:[%s3076_s3 + $0x60] sm:$0xff]  ;;  %v2215_v62 = vpack.c.bf16 %v1520_v49, %v1519_v52  ;;  %v1550_v46 = vld [vmem:[%s3076_s3 + $0x308] sm:$0xff] }
 0x133   :  { %626 = vrot.lane.b32.xlu0 %v2649_v47, %s2327_s2  ;;  %v2158_v7 = vpack.c.bf16 %v679_v60, %v678_v58  ;;  %v1506_v52 = vld [vmem:[%s3076_s3 + $0x1c0] sm:$0xff]  ;;  %v1552_v58 = vld [vmem:[%s3076_s3 + $0x318] sm:$0xff] }
 0x135   :  { %612 = vrot.lane.b32.xlu1 %v2655_v53, %s2327_s2 }
 0x137   :  { %628 = vrot.lane.b32.xlu0 %v2658_v55, %s2327_s2 }
 0x139   :  { %614 = vrot.lane.b32.xlu1 %v2664_v59, %s2327_s2 }
 0x13b   :  { %630 = vrot.lane.b32.xlu0 %v2666_v61, %s2327_s2 }
 0x13d   :  { %616 = vrot.lane.b32.xlu1 %v2672_v63, %s2327_s2 }
 0x13f   :  { %632 = vrot.lane.b32.xlu0 %v2674_v1, %s2327_s2 }
 0x193   :  { %v2680_v2 = vpop.permute.xlu1 %618 }
 0x194   :  { %v658_v8 = vmax.f32 %v2573_v48, %v2680_v2  ;;  %v1524_v48 = vld [vmem:[%s3076_s3 + $0x248] sm:$0xff] }
 0x195   :  { %v621_v3 = vpop.permute.xlu0 %620 }
 0x196   :  { %v659_v4 = vmax.f32 %v2576_v30, %v621_v3  ;;  %v668_v30 = vld [vmem:[%s3076_s3 + $0x10] sm:$0xff] }
 0x197   :  { %v2689_v9 = vpop.permute.xlu1 %602  ;;  %v2143_v22 = vpack.c.bf16 %v669_v16, %v668_v30  ;;  %v1521_v3 = vld [vmem:[%s3076_s3 + $0x230] sm:$0xff]  ;;  %v1523_v16 = vld [vmem:[%s3076_s3 + $0x240] sm:$0xff] }
 0x198   :  { %v699_v12 = vrot.slane %v659_v4, 7  ;;  %v1522_v4 = vld [vmem:[%s3076_s3 + $0x238] sm:$0xff]  ;;  %v1496_v30 = vld [vmem:[%s3076_s3 + $0x170] sm:$0xff]  ;;  %v650_v2 = vmax.f32 %v2588_v0, %v2689_v9  ;;  %v1498_v0 = vld [vmem:[%s3076_s3 + $0x180] sm:$0xff] }
 0x199   :  { %v605_v11 = vpop.permute.xlu0 %604 }
 0x19a   :  { %v651_v13 = vmax.f32 %v2596_v6, %v605_v11  ;;  %v1511_v6 = vld [vmem:[%s3076_s3 + $0x1e0] sm:$0xff]  ;;  %v2218_v11 = vpack.c.bf16 %v1522_v4, %v1521_v3  ;;  %v1507_v3 = vld [vmem:[%s3076_s3 + $0x1c8] sm:$0xff]  ;;  %v1508_v4 = vld [vmem:[%s3076_s3 + $0x1d0] sm:$0xff] }
 0x19b   :  { %v607_v18 = vpop.permute.xlu1 %606  ;;  %v2203_v27 = vpack.c.bf16 %v1512_v20, %v1511_v6  ;;  %v2221_v20 = vpack.c.bf16 %v1524_v48, %v1523_v16  ;;  %v1527_v16 = vld [vmem:[%s3076_s3 + $0x258] sm:$0xff] }
 0x19c   :  { %v701_v17 = vsel %vm700_vm5, %v699_v12, %v651_v13  ;;  %v652_v25 = vmax.f32 %v2601_v10, %v607_v18  ;;  %v672_v10 = vld [vmem:[%s3076_s3 + $0x30] sm:$0xff]  ;;  %v1495_v12 = vld [vmem:[%s3076_s3 + $0x168] sm:$0xff]  ;;  %v777_v18 = vrot.slane %v658_v8, 7  ;;  %v1553_v8 = vld [vmem:[%s3076_s3 + $0x320] sm:$0xff] }
 0x19d   :  { %1837 = vmatmul.mubr.msk.f32.vlgmr.msra.gmra.mrb[0].mxu1 %vm702_vm4, %v701_v17  ;;  %v623_v19 = vpop.permute.xlu0 %622  ;;  %v2149_v38 = vpack.c.bf16 %v673_v34, %v672_v10  ;;  %v680_v17 = vld [vmem:[%s3076_s3 + $0x70] sm:$0xff]  ;;  %v2182_v6 = vpack.c.bf16 %v1496_v30, %v1495_v12  ;;  %v1546_v10 = vld [vmem:[%s3076_s3 + $0x2e8] sm:$0xff] }
 0x19e   :  { %2141 = vmatpush3.bf16.msra.mxu1 %v2140_v14  ;;  %v660_v21 = vmax.f32 %v2612_v15, %v623_v19  ;;  %1869 = vmatprep.mubr.msk.f32.mxu1 %vm2328_vm3, %v2324_v5  ;;  %v1513_v15 = vld [vmem:[%s3076_s3 + $0x1f0] sm:$0xff]  ;;  %v778_v9 = vsel %vm700_vm5, %v777_v18, %v650_v2 }
 0x19f   :  { %2142 = vmatprep.subr.bf16.mxu1 %v2325_v56  ;;  %v2206_v35 = vpack.c.bf16 %v1514_v28, %v1513_v15  ;;  %v2791_v13 = vpop.permute.xlu1 %608  ;;  %v1500_v15 = vld [vmem:[%s3076_s3 + $0x190] sm:$0xff] }
 0x1a0   :  { %v869_v26 = vrot.slane %v660_v21, 7  ;;  %v1497_v21 = vld [vmem:[%s3076_s3 + $0x178] sm:$0xff] }
 0x1a1   :  { %v2769_v57 = vpop.permute.xlu0 %624 }
 0x1a2   :  { %v870_v29 = vsel %vm700_vm5, %v869_v26, %v652_v25  ;;  %2144 = vmatpush3.bf16.msra.mxu1 %v2143_v22  ;;  %v2185_v25 = vpack.c.bf16 %v1498_v0, %v1497_v21  ;;  %v1525_v26 = vld [vmem:[%s3076_s3 + $0x250] sm:$0xff]  ;;  %v661_v12 = vmax.f32 %v2631_v32, %v2769_v57  ;;  %v1556_v57 = vld [vmem:[%s3076_s3 + $0x338] sm:$0xff] }
 0x1a3   :  { %1903 = vmatmul.mubr.msk.f32.vlgmr.msra.gmra.mrb[4].mxu0 %vm702_vm4, %v870_v29  ;;  %2145 = vmatprep.subr.bf16.mxu1 %v2325_v56  ;;  %v611_v22 = vpop.permute.xlu1 %610  ;;  %v1555_v32 = vld [vmem:[%s3076_s3 + $0x330] sm:$0xff] }
 0x1a4   :  { %2204 = vmatpush3.bf16.msra.mxu0 %v2203_v27  ;;  %1968 = vmatprep.mubr.msk.f32.mxu0 %vm2328_vm3, %v2324_v5  ;;  %v1499_v27 = vld [vmem:[%s3076_s3 + $0x188] sm:$0xff]  ;;  %v654_v28 = vmax.f32 %v2643_v42, %v611_v22  ;;  %v1501_v42 = vld [vmem:[%s3076_s3 + $0x198] sm:$0xff]  ;;  %v962_v18 = vrot.slane %v661_v12, 7  ;;  %v2263_v0 = vpack.c.bf16 %v1556_v57, %v1555_v32  ;;  %v1530_v22 = vld [vmem:[%s3076_s3 + $0x270] sm:$0xff] }
 0x1a5   :  { %2205 = vmatprep.subr.bf16.mxu0 %v2325_v56  ;;  %v627_v14 = vpop.permute.xlu0 %626  ;;  %v2191_v40 = vpack.c.bf16 %v1502_v36, %v1501_v42  ;;  %v1538_v42 = vld [vmem:[%s3076_s3 + $0x2b0] sm:$0xff]  ;;  %v1570_v12 = vld [vmem:[%s3076_s3 + $0x3a0] sm:$0xff] }
 0x1a6   :  { %2147 = vmatpush3.bf16.msra.mxu1 %v2146_v33  ;;  %v662_v19 = vmax.f32 %v2649_v47, %v627_v14  ;;  %v1543_v47 = vld [vmem:[%s3076_s3 + $0x2d0] sm:$0xff]  ;;  %v1545_v33 = vld [vmem:[%s3076_s3 + $0x2e0] sm:$0xff]  ;;  %v2200_v14 = vpack.c.bf16 %v1508_v4, %v1507_v3  ;;  %v1567_v4 = vld [vmem:[%s3076_s3 + $0x388] sm:$0xff] }
 0x1a7   :  { %2148 = vmatprep.subr.bf16.mxu1 %v2325_v56  ;;  %v2245_v29 = vpack.c.bf16 %v1544_v23, %v1543_v47  ;;  %v2248_v37 = vpack.c.bf16 %v1546_v10, %v1545_v33  ;;  %v2915_v48 = vpop.permute.xlu1 %612  ;;  %v1535_v33 = vld [vmem:[%s3076_s3 + $0x298] sm:$0xff]  ;;  %v1536_v10 = vld [vmem:[%s3076_s3 + $0x2a0] sm:$0xff] }
 0x1a8   :  { %2207 = vmatpush3.bf16.msra.mxu0 %v2206_v35  ;;  %v1055_v24 = vrot.slane %v662_v19, 7  ;;  %v2188_v35 = vpack.c.bf16 %v1500_v15, %v1499_v27  ;;  %v1509_v19 = vld [vmem:[%s3076_s3 + $0x1d8] sm:$0xff] }
 0x1a9   :  { %2208 = vmatprep.subr.bf16.mxu0 %v2325_v56 }
 0x1aa   :  { %2150 = vmatpush3.bf16.msra.mxu1 %v2149_v38  ;;  %v1056_v34 = vsel %vm700_vm5, %v1055_v24, %v654_v28  ;;  %v1547_v38 = vld [vmem:[%s3076_s3 + $0x2f0] sm:$0xff]  ;;  %v1531_v24 = vld [vmem:[%s3076_s3 + $0x278] sm:$0xff]  ;;  %v1533_v28 = vld [vmem:[%s3076_s3 + $0x288] sm:$0xff] }
 0x1ab   :  { %2151 = vmatprep.subr.bf16.mxu1 %v2325_v56  ;;  %v2251_v44 = vpack.c.bf16 %v1548_v39, %v1547_v38  ;;  %v615_v23 = vpop.permute.xlu1 %614  ;;  %v1540_v38 = vld [vmem:[%s3076_s3 + $0x2c0] sm:$0xff] }
 0x1ac   :  { %2210 = vmatpush3.bf16.msra.mxu0 %v2209_v41  ;;  %v1503_v41 = vld [vmem:[%s3076_s3 + $0x1a8] sm:$0xff] }
 0x1ad   :  { %2211 = vmatprep.subr.bf16.mxu0 %v2325_v56  ;;  %v2194_v50 = vpack.c.bf16 %v1504_v43, %v1503_v41  ;;  %v1559_v41 = vld [vmem:[%s3076_s3 + $0x348] sm:$0xff]  ;;  %v1560_v43 = vld [vmem:[%s3076_s3 + $0x350] sm:$0xff] }
 0x1ae   :  { %2153 = vmatpush3.bf16.msra.mxu1 %v2152_v45  ;;  %v1549_v45 = vld [vmem:[%s3076_s3 + $0x300] sm:$0xff] }
 0x1af   :  { %2154 = vmatprep.subr.bf16.mxu1 %v2325_v56  ;;  %v2254_v49 = vpack.c.bf16 %v1550_v46, %v1549_v45  ;;  %v655_v45 = vmax.f32 %v2655_v53, %v2915_v48  ;;  %v2266_v46 = vpack.c.bf16 %v1560_v43, %v1559_v41  ;;  %v1563_v53 = vld [vmem:[%s3076_s3 + $0x368] sm:$0xff]  ;;  %v1572_v48 = vld [vmem:[%s3076_s3 + $0x3b0] sm:$0xff]  ;;  %v617_v32 = vpop.permute.xlu1 %616 }
 0x1b0   :  { %2213 = vmatpush3.bf16.msra.mxu0 %v2212_v51  ;;  %v1505_v51 = vld [vmem:[%s3076_s3 + $0x1b8] sm:$0xff] }
 0x1b1   :  { %2214 = vmatprep.subr.bf16.mxu0 %v2325_v56  ;;  %v2197_v60 = vpack.c.bf16 %v1506_v52, %v1505_v51  ;;  %v1562_v51 = vld [vmem:[%s3076_s3 + $0x360] sm:$0xff] }
 0x1b2   :  { %2156 = vmatpush3.bf16.msra.mxu1 %v2155_v54  ;;  %v1551_v54 = vld [vmem:[%s3076_s3 + $0x310] sm:$0xff] }
 0x1b3   :  { %2157 = vmatprep.subr.bf16.mxu1 %v2325_v56 }
 0x1b4   :  { %2216 = vmatpush3.bf16.msra.mxu0 %v2215_v62  ;;  %v2893_v62 = vpop.permute.xlu0 %628 }
 0x1b5   :  { %2217 = vmatprep.subr.bf16.mxu0 %v2325_v56  ;;  %v663_v39 = vmax.f32 %v2658_v55, %v2893_v62  ;;  %v1541_v55 = vld [vmem:[%s3076_s3 + $0x2c8] sm:$0xff]  ;;  %v1566_v62 = vld [vmem:[%s3076_s3 + $0x380] sm:$0xff] }
 0x1b6   :  { %2159 = vmatpush3.bf16.msra.mxu1 %v2158_v7  ;;  %v2257_v7 = vpack.c.bf16 %v1552_v58, %v1551_v54  ;;  %v1564_v54 = vld [vmem:[%s3076_s3 + $0x370] sm:$0xff] }
 0x1b7   :  { %1867 = vmatprep.subr.mxu1 %v2324_v5  ;;  %v2272_v58 = vpack.c.bf16 %v1564_v54, %v1563_v53 }
 0x1b8   :  { %2219 = vmatpush3.bf16.msra.mxu0 %v2218_v11  ;;  %v1554_v11 = vld [vmem:[%s3076_s3 + $0x328] sm:$0xff]  ;;  %v631_v2 = vpop.permute.xlu0 %630 }
 0x1b9   :  { %2220 = vmatprep.subr.bf16.mxu0 %v2325_v56  ;;  %v2260_v30 = vpack.c.bf16 %v1554_v11, %v1553_v8  ;;  %v1569_v11 = vld [vmem:[%s3076_s3 + $0x398] sm:$0xff] }
 0x1ba   :  { %1868 = vmatpush3.msra.mxu1 %v680_v17  ;;  %v1528_v17 = vld [vmem:[%s3076_s3 + $0x260] sm:$0xff] }
 0x1bb   :  { %1870 = vmatmul.mubr.msk.f32.vlgmr.msra.gmra.mrb[2].mxu1 %vm702_vm4, %v778_v9  ;;  %2181 = vmatprep.subr.bf16.mxu1 %v2325_v56  ;;  %v2224_v21 = vpack.c.bf16 %v1528_v17, %v1527_v16  ;;  %v1529_v9 = vld [vmem:[%s3076_s3 + $0x268] sm:$0xff] }
 0x1bc   :  { %2183 = vmatpush3.bf16.msra.mxu1 %v2182_v6  ;;  %2222 = vmatpush3.bf16.msra.mxu0 %v2221_v20  ;;  %v653_v6 = vmax.f32 %v2629_v31, %v2791_v13  ;;  %v664_v20 = vmax.f32 %v2666_v61, %v631_v2  ;;  %v2227_v61 = vpack.c.bf16 %v1530_v22, %v1529_v9  ;;  %v1557_v13 = vld [vmem:[%s3076_s3 + $0x340] sm:$0xff]  ;;  %v1571_v16 = vld [vmem:[%s3076_s3 + $0x3a8] sm:$0xff] }
 0x1bd   :  { %2184 = vmatprep.subr.bf16.mxu1 %v2325_v56  ;;  %1966 = vmatprep.subr.mxu0 %v2324_v5  ;;  %v2284_v17 = vpack.c.bf16 %v1572_v48, %v1571_v16 }
 0x1be   :  { %1935 = vmatprep.mubr.msk.f32.mxu1 %vm2328_vm3, %v2324_v5  ;;  %v963_v47 = vsel %vm700_vm5, %v962_v18, %v653_v6  ;;  %v1241_v31 = vrot.slane %v664_v20, 7  ;;  %v1573_v18 = vld [vmem:[%s3076_s3 + $0x3b8] sm:$0xff] }
 0x1c0   :  { %2186 = vmatpush3.bf16.msra.mxu1 %v2185_v25  ;;  %1967 = vmatpush3.msra.mxu0 %v1525_v26  ;;  %v1532_v25 = vld [vmem:[%s3076_s3 + $0x280] sm:$0xff]  ;;  %v656_v26 = vmax.f32 %v2664_v59, %v615_v23  ;;  %v1534_v59 = vld [vmem:[%s3076_s3 + $0x290] sm:$0xff] }
 0x1c1   :  { %1969 = vmatmul.mubr.msk.f32.vlgmr.msra.gmra.mrb[6].mxu0 %vm702_vm4, %v1056_v34  ;;  %2244 = vmatprep.subr.bf16.mxu0 %v2325_v56  ;;  %v2230_v15 = vpack.c.bf16 %v1532_v25, %v1531_v24  ;;  %v2236_v34 = vpack.c.bf16 %v1536_v10, %v1535_v33 }
 0x1c2   :  { %2246 = vmatpush3.bf16.msra.mxu0 %v2245_v29  ;;  %2187 = vmatprep.subr.bf16.mxu1 %v2325_v56  ;;  %v1242_v27 = vsel %vm700_vm5, %v1241_v31, %v656_v26  ;;  %v2233_v29 = vpack.c.bf16 %v1534_v59, %v1533_v28 }
 0x1c3   :  { %2247 = vmatprep.subr.bf16.mxu0 %v2325_v56  ;;  %2034 = vmatprep.mubr.msk.f32.mxu0 %vm2328_vm3, %v2324_v5 }
 0x1c4   :  { %2189 = vmatpush3.bf16.msra.mxu1 %v2188_v35  ;;  %v1537_v35 = vld [vmem:[%s3076_s3 + $0x2a8] sm:$0xff] }
 0x1c5   :  { %2190 = vmatprep.subr.bf16.mxu1 %v2325_v56  ;;  %v2239_v36 = vpack.c.bf16 %v1538_v42, %v1537_v35 }
 0x1c6   :  { %2249 = vmatpush3.bf16.msra.mxu0 %v2248_v37  ;;  %v1539_v37 = vld [vmem:[%s3076_s3 + $0x2b8] sm:$0xff] }
 0x1c7   :  { %2250 = vmatprep.subr.bf16.mxu0 %v2325_v56 }
 0x1c8   :  { %2192 = vmatpush3.bf16.msra.mxu1 %v2191_v40  ;;  %v2242_v40 = vpack.c.bf16 %v1540_v38, %v1539_v37 }
 0x1c9   :  { %2193 = vmatprep.subr.bf16.mxu1 %v2325_v56 }
 0x1ca   :  { %2252 = vmatpush3.bf16.msra.mxu0 %v2251_v44  ;;  %v1148_v44 = vrot.slane %v663_v39, 7 }
 0x1cb   :  { %2253 = vmatprep.subr.bf16.mxu0 %v2325_v56 }
 0x1cc   :  { %2195 = vmatpush3.bf16.msra.mxu1 %v2194_v50  ;;  %v1561_v50 = vld [vmem:[%s3076_s3 + $0x358] sm:$0xff]  ;;  %v1149_v52 = vsel %vm700_vm5, %v1148_v44, %v655_v45 }
 0x1cd   :  { %2196 = vmatprep.subr.bf16.mxu1 %v2325_v56 }
 0x1ce   :  { %2255 = vmatpush3.bf16.msra.mxu0 %v2254_v49  ;;  %v2269_v49 = vpack.c.bf16 %v1562_v51, %v1561_v50 }
 0x1cf   :  { %2256 = vmatprep.subr.bf16.mxu0 %v2325_v56 }
 0x1d0   :  { %2198 = vmatpush3.bf16.msra.mxu1 %v2197_v60  ;;  %v1565_v60 = vld [vmem:[%s3076_s3 + $0x378] sm:$0xff] }
 0x1d1   :  { %2199 = vmatprep.subr.bf16.mxu1 %v2325_v56  ;;  %v2275_v3 = vpack.c.bf16 %v1566_v62, %v1565_v60 }
 0x1d2   :  { %2258 = vmatpush3.bf16.msra.mxu0 %v2257_v7  ;;  %v1568_v7 = vld [vmem:[%s3076_s3 + $0x390] sm:$0xff] }
 0x1d3   :  { %2259 = vmatprep.subr.bf16.mxu0 %v2325_v56  ;;  %v2278_v8 = vpack.c.bf16 %v1568_v7, %v1567_v4 }
 0x1d4   :  { %2201 = vmatpush3.bf16.msra.mxu1 %v2200_v14  ;;  %v2281_v14 = vpack.c.bf16 %v1570_v12, %v1569_v11 }
 0x1d5   :  { %1933 = vmatprep.subr.mxu1 %v2324_v5 }
 0x1d6   :  { %2261 = vmatpush3.bf16.msra.mxu0 %v2260_v30  ;;  %v633_v30 = vpop.permute.xlu0 %632 }
 0x1d7   :  { %2262 = vmatprep.subr.bf16.mxu0 %v2325_v56  ;;  %v665_v2 = vmax.f32 %v2674_v1, %v633_v30 }
 0x1d8   :  { %1934 = vmatpush3.msra.mxu1 %v1509_v19  ;;  %v657_v19 = vmax.f32 %v2672_v63, %v617_v32 }
 0x1d9   :  { %1936 = vmatmul.mubr.msk.f32.vlgmr.msra.gmra.mrb[4].mxu1 %vm702_vm4, %v963_v47  ;;  %2223 = vmatprep.subr.bf16.mxu1 %v2325_v56  ;;  %v1334_v57 = vrot.slane %v665_v2, 7 }
 0x1da   :  { %2225 = vmatpush3.bf16.msra.mxu1 %v2224_v21  ;;  %2264 = vmatpush3.bf16.msra.mxu0 %v2263_v0 }
 0x1db   :  { %2226 = vmatprep.subr.bf16.mxu1 %v2325_v56  ;;  %2032 = vmatprep.subr.mxu0 %v2324_v5  ;;  %v1335_v6 = vsel %vm700_vm5, %v1334_v57, %v657_v19 }
 0x1dc   :  { %2001 = vmatprep.mubr.msk.f32.mxu1 %vm2328_vm3, %v2324_v5 }
 0x1de   :  { %2228 = vmatpush3.bf16.msra.mxu1 %v2227_v61  ;;  %2033 = vmatpush3.msra.mxu0 %v1557_v13 }
 0x1df   :  { %2035 = vmatmul.mubr.msk.f32.vlgmr.msra.gmra.mrb[8].mxu0 %vm702_vm4, %v1242_v27  ;;  %2229 = vmatprep.subr.bf16.mxu1 %v2325_v56 }
 0x1e2   :  { %2231 = vmatpush3.bf16.msra.mxu1 %v2230_v15 }
 0x1e3   :  { %2232 = vmatprep.subr.bf16.mxu1 %v2325_v56 }
 0x1e6   :  { %2234 = vmatpush3.bf16.msra.mxu1 %v2233_v29  ;;  %v1575_v29 = vld [vmem:[%s3077_s4] ss:$0 sm:$0xff] }
 0x1e7   :  { %2235 = vmatprep.subr.bf16.mxu1 %v2325_v56 }
 0x1ea   :  { %2237 = vmatpush3.bf16.msra.mxu1 %v2236_v34 }
 0x1eb   :  { %2238 = vmatprep.subr.bf16.mxu1 %v2325_v56 }
 0x1ee   :  { %2240 = vmatpush3.bf16.msra.mxu1 %v2239_v36 }
 0x1ef   :  { %2241 = vmatprep.subr.bf16.mxu1 %v2325_v56 }
 0x1f2   :  { %2243 = vmatpush3.bf16.msra.mxu1 %v2242_v40 }
 0x1f3   :  { %1999 = vmatprep.subr.mxu1 %v2324_v5 }
 0x1f6   :  { %2000 = vmatpush3.msra.mxu1 %v1541_v55 }
 0x1f7   :  { %2002 = vmatmul.mubr.msk.f32.vlgmr.msra.gmra.mrb[6].mxu1 %vm702_vm4, %v1149_v52  ;;  %2265 = vmatprep.subr.bf16.mxu1 %v2325_v56 }
 0x1f8   :  { %2267 = vmatpush3.bf16.msra.mxu1 %v2266_v46  ;;  %2067 = vmatprep.mubr.msk.f32.mxu1 %vm2328_vm3, %v2324_v5 }
 0x1f9   :  { %2268 = vmatprep.subr.bf16.mxu1 %v2325_v56 }
 0x1fc   :  { %2270 = vmatpush3.bf16.msra.mxu1 %v2269_v49 }
 0x1fd   :  { %2271 = vmatprep.subr.bf16.mxu1 %v2325_v56 }
 0x200   :  { %2273 = vmatpush3.bf16.msra.mxu1 %v2272_v58 }
 0x201   :  { %2274 = vmatprep.subr.bf16.mxu1 %v2325_v56 }
 0x204   :  { %2276 = vmatpush3.bf16.msra.mxu1 %v2275_v3 }
 0x205   :  { %2277 = vmatprep.subr.bf16.mxu1 %v2325_v56 }
 0x208   :  { %2279 = vmatpush3.bf16.msra.mxu1 %v2278_v8 }
 0x209   :  { %2280 = vmatprep.subr.bf16.mxu1 %v2325_v56 }
 0x20c   :  { %2282 = vmatpush3.bf16.msra.mxu1 %v2281_v14 }
 0x20d   :  { %2283 = vmatprep.subr.bf16.mxu1 %v2325_v56 }
 0x210   :  { %2285 = vmatpush3.bf16.msra.mxu1 %v2284_v17 }
 0x211   :  { %2065 = vmatprep.subr.mxu1 %v2324_v5 }
 0x214   :  { %2066 = vmatpush3.msra.mxu1 %v1573_v18 }
 0x215   :  { %2068 = vmatmul.mubr.msk.f32.vlgmr.msra.gmra.mrb[8].mxu1 %vm702_vm4, %v1335_v6 }
 0x270   :  { %v771_v1 = vpop.f32.mrb[0].mxu1 }
 0x271   :  { %v1838_v20 = vpop.f32.mrb[1].mxu1 }
 0x276   :  { %v939_v21 = vpop.f32.mrb[4].mxu0 }
 0x277   :  { %v1904_v56 = vpop.f32.mrb[5].mxu0 }
 0x28e   :  { %v847_v0 = vpop.f32.mrb[2].mxu1 }
 0x28f   :  { %v848_v9 = vadd.f32 %v847_v0, %v771_v1  ;;  %v1871_v22 = vpop.f32.mrb[3].mxu1 }
 0x291   :  { %v943_v47 = vadd.f32 %v939_v21, %v848_v9 }
 0x294   :  { %v1125_v5 = vpop.f32.mrb[6].mxu0 }
 0x295   :  { %v1970_v23 = vpop.f32.mrb[7].mxu0 }
 0x2ac   :  { %v1032_v31 = vpop.f32.mrb[4].mxu1 }
 0x2ad   :  { %v1036_v61 = vadd.f32 %v1032_v31, %v943_v47  ;;  %v1937_v13 = vpop.f32.mrb[5].mxu1 }
 0x2af   :  { %v1129_v24 = vadd.f32 %v1125_v5, %v1036_v61 }
 0x2b2   :  { %v1311_v63 = vpop.f32.mrb[8].mxu0 }
 0x2b3   :  { %v2036_v25 = vpop.f32.mrb[9].mxu0 }
 0x2ca   :  { %v1218_v26 = vpop.f32.mrb[6].mxu1 }
 0x2cb   :  { %v1222_v27 = vadd.f32 %v1218_v26, %v1129_v24  ;;  %v2003_v15 = vpop.f32.mrb[7].mxu1 }
 0x2cd   :  { %v1315_v28 = vadd.f32 %v1311_v63, %v1222_v27 }
 0x2e8   :  { %v1404_v59 = vpop.f32.mrb[8].mxu1 }
 0x2e9   :  { %v1408_v33 = vadd.f32 %v1404_v59, %v1315_v28  ;;  %v2069_v10 = vpop.f32.mrb[9].mxu1 }
 0x2eb   :  { %v1416_v34 = vadd.f32 %v1575_v29, %v1408_v33 }
 0x2ed   :  { %1418 = vst.msk [vmem:[#allocation3] sm:$0x3] %vm1417_vm6, %v1416_v34 }
 0x2ee   :  { %2311 = shalt.err (!%p2308_p4)
}
 0x2ef   :  { %s2312_s0 = scalar_lea.hbm %s3078_s5, 32 }
 0x2f0   :  { %p2313_p5 = scmp.ne.s32.totalorder %s3078_s5, %s2312_s0  ;;  %p2316_p6 = scmp.lt.u32.totalorder %s2312_s0, %s3078_s5 }
 0x2f2   :  { %p2318_p7 = pnand %p2316_p6, %p2313_p5 }
 0x2f4   :  { %2321 = shalt.err (!%p2318_p7)
}
 0x2f5   :  { %1428 = dma.vmem_to_hbm [thread:$0]  %s1426_s17, 32, %s3078_s5, [#allocation4]  }
 0x2f6   :  { %2322 = dma.done.wait [#allocation4], 32  }
 0x2f7   :  { %2323 = vsyncadd [#allocation4], 4294967264 }
 0x2f8   :  { %1432 = vsyncpa [#allocation4], 1 }

</bundles_post_ra>
